<compile_context>
chip_gen: v5e
topology: v5e:2x2
jax: 0.10.0
libtpu: 0.0.40
codegen_flags: <defaults>
</compile_context>

<pallas_src>
import math

import jax
import jax.numpy as jnp
from jax.experimental import pallas as pl
from jax.experimental.pallas import tpu as pltpu

KERNEL_SIZE = 15
SIGMA = 2.2
PAD = KERNEL_SIZE // 2

_PREC = jax.lax.Precision.HIGHEST
_MAX_CHANNEL_UNROLL = 16            # cap static per-channel matmul unroll in the kernel body
_VMEM_BUDGET = 8 * 1024 * 1024      # conservative per-step budget (fits v5e 16 MiB default)


def _gaussian_taps_1d(kernel_size: int, sigma: float):
    """Normalized 1D Gaussian taps; outer(g, g) equals the module's normalized 2D kernel."""
    half = (kernel_size - 1) / 2.0
    g = [math.exp(-0.5 * ((i - half) ** 2) / (sigma * sigma)) for i in range(kernel_size)]
    s = sum(g)
    return tuple(v / s for v in g)


TAPS_1D = _gaussian_taps_1d(KERNEL_SIZE, SIGMA)


def create_gaussian_kernel(kernel_size: int, sigma: float) -> jnp.ndarray:
    """2D kernel identical to the PyTorch module's buffer (used only for the reference check)."""
    ax = jnp.linspace(-(kernel_size - 1) / 2.0, (kernel_size - 1) / 2.0, kernel_size)
    xx, yy = jnp.meshgrid(ax, ax)
    kernel = jnp.exp(-0.5 * (jnp.square(xx) + jnp.square(yy)) / jnp.square(sigma))
    kernel = kernel / jnp.sum(kernel)
    return kernel.astype(jnp.float32)


def _toeplitz_band(n: int) -> jnp.ndarray:
    """Banded symmetric Toeplitz matrix T with T[i, j] = g[j - i + PAD] for |i-j| <= PAD.

    Left-multiplying (T @ v) blurs along the leading axis with zero padding; since the
    Gaussian is symmetric, T also works as the right factor for the trailing axis.
    """
    taps = jnp.asarray(TAPS_1D, dtype=jnp.float32)
    idx = jnp.arange(n)
    d = idx[None, :] - idx[:, None] + PAD
    valid = (d >= 0) & (d < KERNEL_SIZE)
    return jnp.where(valid, taps[jnp.clip(d, 0, KERNEL_SIZE - 1)], 0.0).astype(jnp.float32)


def _blur_kernel(th_ref, tw_ref, x_ref, o_ref):
    # th_ref: (H, H) column-blur Toeplitz, tw_ref: (W, W) row-blur Toeplitz.
    # x_ref / o_ref: (Bb, H, W) channel block, W in lanes.
    th = th_ref[...]
    tw = tw_ref[...]
    bb = x_ref.shape[0]
    for c in range(bb):  # static unroll over the channel block (bounded by _MAX_CHANNEL_UNROLL)
        # Column pass on the MXU: (H, H) @ (H, W) -> blur along H (zero halo in the band).
        y = jnp.dot(th, x_ref[c], precision=_PREC, preferred_element_type=jnp.float32)
        # Row pass on the MXU: (H, W) @ (W, W) -> blur along W.
        o_ref[c] = jnp.dot(y, tw, precision=_PREC,
                           preferred_element_type=jnp.float32).astype(o_ref.dtype)


def _pick_channel_block(B: int, H: int, W: int) -> int:
    """Channel-block size: fits the VMEM budget, keeps >=2 grid steps, divides B."""
    per_chan = H * W * 4
    # ~= double-buffered input + output blocks + in-flight temporaries per step.
    cap = max(1, _VMEM_BUDGET // (5 * per_chan))
    bb = max(1, min(B, cap, _MAX_CHANNEL_UNROLL))
    if B >= 2:
        bb = min(bb, -(-B // 2))     # ensure at least 2 grid steps (pipelining / 2-TC v7x)
    while B % bb:
        bb -= 1
    return bb


def gaussian_blur(x: jnp.ndarray) -> jnp.ndarray:
    """Depthwise 15x15 Gaussian blur, zero padding. x: (N, C, H, W) f32 -> (N, C, H, W) f32."""
    N, C, H, W = x.shape
    B = N * C

    xf = x.reshape(B, H, W)          # free view, no HBM transpose
    th = _toeplitz_band(H)
    tw = _toeplitz_band(W)

    Bb = _pick_channel_block(B, H, W)
    grid = (pl.cdiv(B, Bb),)

    out = pl.pallas_call(
        _blur_kernel,
        out_shape=jax.ShapeDtypeStruct((B, H, W), jnp.float32),
        grid=grid,
        in_specs=[
            pl.BlockSpec((H, H), lambda b: (0, 0)),       # T_H, resident across grid steps
            pl.BlockSpec((W, W), lambda b: (0, 0)),       # T_W, resident across grid steps
            pl.BlockSpec((Bb, H, W), lambda b: (b, 0, 0)),
        ],
        out_specs=pl.BlockSpec((Bb, H, W), lambda b: (b, 0, 0)),
        compiler_params=pltpu.CompilerParams(
            dimension_semantics=("parallel",),
            vmem_limit_bytes=32 * 1024 * 1024,
        ),
    )(th, tw, xf)

    return out.reshape(N, C, H, W)


def _reference(x, weight):
    # Depthwise conv reference via lax.conv_general_dilated (groups = C), zero padding.
    C = x.shape[1]
    k = jnp.broadcast_to(weight[None, None, :, :], (C, 1, KERNEL_SIZE, KERNEL_SIZE))
    return jax.lax.conv_general_dilated(
        x, k, window_strides=(1, 1), padding=[(PAD, PAD), (PAD, PAD)],
        dimension_numbers=("NCHW", "OIHW", "NCHW"), feature_group_count=C,
        precision=jax.lax.Precision.HIGHEST)


if __name__ == "__main__":
    key = jax.random.PRNGKey(0)
    N, C, H, W = 2, 4, 16, 16
    x = jax.random.normal(key, (N, C, H, W), dtype=jnp.float32)

    out = jax.block_until_ready(gaussian_blur(x))

    weight = create_gaussian_kernel(KERNEL_SIZE, SIGMA)
    ref = jax.block_until_ready(_reference(x, weight))

    assert out.shape == (N, C, H, W)
    assert jnp.allclose(out, ref, rtol=1e-4, atol=1e-5), "mismatch vs reference conv"

    print("KERNEL_OK")
</pallas_src>

<mosaic_0001>
module attributes {stable_mosaic.version = 11 : i64} {
  func.func @_blur_kernel(%arg0: i32, %arg1: memref<16x16xf32, #tpu.memory_space<vmem>>, %arg2: memref<16x16xf32, #tpu.memory_space<vmem>>, %arg3: memref<4x16x16xf32, #tpu.memory_space<vmem>>, %arg4: memref<4x16x16xf32, #tpu.memory_space<vmem>>) attributes {dimension_semantics = [#tpu.dimension_semantics<parallel>], iteration_bounds = array<i64: 2>, scalar_prefetch = 0 : i64, scratch_operands = 0 : i64, tpu.core_type = #tpu.core_type<tc>, window_params = [{pipeline_mode = #tpu.pipeline_mode<synchronous>, transform_indices = @transform_0, window_bounds = array<i64: 16, 16>}, {pipeline_mode = #tpu.pipeline_mode<synchronous>, transform_indices = @transform_1, window_bounds = array<i64: 16, 16>}, {transform_indices = @transform_2, window_bounds = array<i64: 4, 16, 16>}, {transform_indices = @transform_3, window_bounds = array<i64: 4, 16, 16>}]} {
    %c0 = arith.constant 0 : index
    %c0_0 = arith.constant 0 : index
    %0 = vector.load %arg1[%c0, %c0_0] : memref<16x16xf32, #tpu.memory_space<vmem>>, vector<16x16xf32>
    %c0_1 = arith.constant 0 : index
    %c0_2 = arith.constant 0 : index
    %1 = vector.load %arg2[%c0_1, %c0_2] : memref<16x16xf32, #tpu.memory_space<vmem>>, vector<16x16xf32>
    %c0_3 = arith.constant 0 : index
    %c0_4 = arith.constant 0 : index
    %c0_5 = arith.constant 0 : index
    %2 = vector.load %arg3[%c0_3, %c0_4, %c0_5] : memref<4x16x16xf32, #tpu.memory_space<vmem>>, vector<1x16x16xf32>
    %3 = vector.shape_cast %2 : vector<1x16x16xf32> to vector<16x16xf32>
    %cst = arith.constant dense<0.000000e+00> : vector<16x16xf32>
    %4 = tpu.matmul %0, %3, %cst {dimension_numbers = #tpu.dot_dimension_numbers<[1], [0], [0], [1], [0, 0, 1, 1], [], []>, precision = #tpu.contract_precision<fp32>} : vector<16x16xf32>, vector<16x16xf32>, vector<16x16xf32> -> vector<16x16xf32>
    %cst_6 = arith.constant dense<0.000000e+00> : vector<16x16xf32>
    %5 = tpu.matmul %4, %1, %cst_6 {dimension_numbers = #tpu.dot_dimension_numbers<[1], [0], [0], [1], [0, 0, 1, 1], [], []>, precision = #tpu.contract_precision<fp32>} : vector<16x16xf32>, vector<16x16xf32>, vector<16x16xf32> -> vector<16x16xf32>
    %c0_7 = arith.constant 0 : index
    %c0_8 = arith.constant 0 : index
    %c0_9 = arith.constant 0 : index
    %6 = vector.load %arg4[%c0_7, %c0_8, %c0_9] : memref<4x16x16xf32, #tpu.memory_space<vmem>>, vector<1x16x16xf32>
    %7 = vector.shape_cast %6 : vector<1x16x16xf32> to vector<16x16xf32>
    %8 = vector.shape_cast %5 : vector<16x16xf32> to vector<1x16x16xf32>
    tpu.vector_store %arg4[%c0_7, %c0_8, %c0_9], %8 {strides = array<i32>} : memref<4x16x16xf32, #tpu.memory_space<vmem>>, vector<1x16x16xf32>,
    %c1 = arith.constant 1 : index
    %c0_10 = arith.constant 0 : index
    %c0_11 = arith.constant 0 : index
    %9 = vector.load %arg3[%c1, %c0_10, %c0_11] : memref<4x16x16xf32, #tpu.memory_space<vmem>>, vector<1x16x16xf32>
    %10 = vector.shape_cast %9 : vector<1x16x16xf32> to vector<16x16xf32>
    %cst_12 = arith.constant dense<0.000000e+00> : vector<16x16xf32>
    %11 = tpu.matmul %0, %10, %cst_12 {dimension_numbers = #tpu.dot_dimension_numbers<[1], [0], [0], [1], [0, 0, 1, 1], [], []>, precision = #tpu.contract_precision<fp32>} : vector<16x16xf32>, vector<16x16xf32>, vector<16x16xf32> -> vector<16x16xf32>
    %cst_13 = arith.constant dense<0.000000e+00> : vector<16x16xf32>
    %12 = tpu.matmul %11, %1, %cst_13 {dimension_numbers = #tpu.dot_dimension_numbers<[1], [0], [0], [1], [0, 0, 1, 1], [], []>, precision = #tpu.contract_precision<fp32>} : vector<16x16xf32>, vector<16x16xf32>, vector<16x16xf32> -> vector<16x16xf32>
    %c1_14 = arith.constant 1 : index
    %c0_15 = arith.constant 0 : index
    %c0_16 = arith.constant 0 : index
    %13 = vector.load %arg4[%c1_14, %c0_15, %c0_16] : memref<4x16x16xf32, #tpu.memory_space<vmem>>, vector<1x16x16xf32>
    %14 = vector.shape_cast %13 : vector<1x16x16xf32> to vector<16x16xf32>
    %15 = vector.shape_cast %12 : vector<16x16xf32> to vector<1x16x16xf32>
    tpu.vector_store %arg4[%c1_14, %c0_15, %c0_16], %15 {strides = array<i32>} : memref<4x16x16xf32, #tpu.memory_space<vmem>>, vector<1x16x16xf32>,
    %c2 = arith.constant 2 : index
    %c0_17 = arith.constant 0 : index
    %c0_18 = arith.constant 0 : index
    %16 = vector.load %arg3[%c2, %c0_17, %c0_18] : memref<4x16x16xf32, #tpu.memory_space<vmem>>, vector<1x16x16xf32>
    %17 = vector.shape_cast %16 : vector<1x16x16xf32> to vector<16x16xf32>
    %cst_19 = arith.constant dense<0.000000e+00> : vector<16x16xf32>
    %18 = tpu.matmul %0, %17, %cst_19 {dimension_numbers = #tpu.dot_dimension_numbers<[1], [0], [0], [1], [0, 0, 1, 1], [], []>, precision = #tpu.contract_precision<fp32>} : vector<16x16xf32>, vector<16x16xf32>, vector<16x16xf32> -> vector<16x16xf32>
    %cst_20 = arith.constant dense<0.000000e+00> : vector<16x16xf32>
    %19 = tpu.matmul %18, %1, %cst_20 {dimension_numbers = #tpu.dot_dimension_numbers<[1], [0], [0], [1], [0, 0, 1, 1], [], []>, precision = #tpu.contract_precision<fp32>} : vector<16x16xf32>, vector<16x16xf32>, vector<16x16xf32> -> vector<16x16xf32>
    %c2_21 = arith.constant 2 : index
    %c0_22 = arith.constant 0 : index
    %c0_23 = arith.constant 0 : index
    %20 = vector.load %arg4[%c2_21, %c0_22, %c0_23] : memref<4x16x16xf32, #tpu.memory_space<vmem>>, vector<1x16x16xf32>
    %21 = vector.shape_cast %20 : vector<1x16x16xf32> to vector<16x16xf32>
    %22 = vector.shape_cast %19 : vector<16x16xf32> to vector<1x16x16xf32>
    tpu.vector_store %arg4[%c2_21, %c0_22, %c0_23], %22 {strides = array<i32>} : memref<4x16x16xf32, #tpu.memory_space<vmem>>, vector<1x16x16xf32>,
    %c3 = arith.constant 3 : index
    %c0_24 = arith.constant 0 : index
    %c0_25 = arith.constant 0 : index
    %23 = vector.load %arg3[%c3, %c0_24, %c0_25] : memref<4x16x16xf32, #tpu.memory_space<vmem>>, vector<1x16x16xf32>
    %24 = vector.shape_cast %23 : vector<1x16x16xf32> to vector<16x16xf32>
    %cst_26 = arith.constant dense<0.000000e+00> : vector<16x16xf32>
    %25 = tpu.matmul %0, %24, %cst_26 {dimension_numbers = #tpu.dot_dimension_numbers<[1], [0], [0], [1], [0, 0, 1, 1], [], []>, precision = #tpu.contract_precision<fp32>} : vector<16x16xf32>, vector<16x16xf32>, vector<16x16xf32> -> vector<16x16xf32>
    %cst_27 = arith.constant dense<0.000000e+00> : vector<16x16xf32>
    %26 = tpu.matmul %25, %1, %cst_27 {dimension_numbers = #tpu.dot_dimension_numbers<[1], [0], [0], [1], [0, 0, 1, 1], [], []>, precision = #tpu.contract_precision<fp32>} : vector<16x16xf32>, vector<16x16xf32>, vector<16x16xf32> -> vector<16x16xf32>
    %c3_28 = arith.constant 3 : index
    %c0_29 = arith.constant 0 : index
    %c0_30 = arith.constant 0 : index
    %27 = vector.load %arg4[%c3_28, %c0_29, %c0_30] : memref<4x16x16xf32, #tpu.memory_space<vmem>>, vector<1x16x16xf32>
    %28 = vector.shape_cast %27 : vector<1x16x16xf32> to vector<16x16xf32>
    %29 = vector.shape_cast %26 : vector<16x16xf32> to vector<1x16x16xf32>
    tpu.vector_store %arg4[%c3_28, %c0_29, %c0_30], %29 {strides = array<i32>} : memref<4x16x16xf32, #tpu.memory_space<vmem>>, vector<1x16x16xf32>,
    return
  }
  func.func @transform_0(%arg0: i32) -> (i32, i32) {
    %c0_i32 = arith.constant 0 : i32
    %c0_i32_0 = arith.constant 0 : i32
    %c0_i32_1 = arith.constant 0 : i32
    return %c0_i32, %c0_i32_0 : i32, i32
  }
  func.func @transform_1(%arg0: i32) -> (i32, i32) {
    %c0_i32 = arith.constant 0 : i32
    %c0_i32_0 = arith.constant 0 : i32
    %c0_i32_1 = arith.constant 0 : i32
    return %c0_i32, %c0_i32_0 : i32, i32
  }
  func.func @transform_2(%arg0: i32) -> (i32, i32, i32) {
    %c0_i32 = arith.constant 0 : i32
    %c0_i32_0 = arith.constant 0 : i32
    %c0_i32_1 = arith.constant 0 : i32
    return %arg0, %c0_i32, %c0_i32_0 : i32, i32, i32
  }
  func.func @transform_3(%arg0: i32) -> (i32, i32, i32) {
    %c0_i32 = arith.constant 0 : i32
    %c0_i32_0 = arith.constant 0 : i32
    %c0_i32_1 = arith.constant 0 : i32
    return %arg0, %c0_i32, %c0_i32_0 : i32, i32, i32
  }
}

</mosaic_0001>

<bundles_post_ra>
// kernel: tpu_custom_call.1
= control target key start
LH: loop header
LB: loop body
LE: loop exit
PB: predicated region body
PF: predicated region fallthrough
CT: control target
= control target key end

     0   :  { %8 = vsyncpa [#allocation3], 0  ;;  %s2552_s0 = inlined_call_operand.hbm [shape: f32[16,16], index: 0, kind: input, shape index: {}]   ;;  %s2553_s1 = inlined_call_operand.hbm [shape: f32[16,16], index: 1, kind: input, shape index: {}]   ;;  %s2554_s2 = inlined_call_operand.hbm [shape: f32[8,16,16], index: 2, kind: input, shape index: {}]   ;;  %s2555_s3 = inlined_call_operand.hbm [shape: f32[8,16,16], index: 3, kind: output, shape index: {}]  }
   0x1   :  { %9 = vsyncpa [#allocation6], 0 }
   0x2   :  { %10 = vsyncpa [#allocation4], 0 }
   0x3   :  { %12 = vsyncpa [#allocation4 + $0x1], 0  ;;  %s2210_s12 = smov 0   ;;  %s2212_s13 = smov 0  }
   0x4   :  { %s2214_s14 = smov 0   ;;  %s2216_s15 = smov 0  }
   0x5 LB: > { %s2231_s16 = sadd.s32 4294967295, %s2182_s15   ;;  %s1911_s17 = sadd.s32 4294967294, %s2182_s15   ;;  %s2182_s15 = sphi %s2216_s15, %s2565_s15   ;;  %s2178_s14 = sphi %s2214_s14, %s2564_s14   ;;  %s2174_s13 = sphi %s2212_s13, %s2563_s13   ;;  %s2170_s12 = sphi %s2210_s12, %s2562_s12  }
   0x6   : > { %p80_p0 = scmp.ne.s32.totalorder %s2174_s13, %s2170_s12  ;;  %p81_p1 = scmp.eq.s32.totalorder %s2231_s16, 0 }
   0x7   : > { %p104_p2 = scmp.eq.s32.totalorder %s2231_s16, 1  ;;  %p110_p3 = scmp.eq.s32.totalorder %s1911_s17, 1 }
   0x8   : > { %p2240_p4 = por %p81_p1, %p80_p0  ;;  %p1912_p5 = scmp.ge.s32.totalorder %s2182_s15, 1 }
   0x9   : > { %p2245_p6 = por %p110_p3, %p80_p0  ;;  %p117_p7 = scmp.lt.s32.totalorder %s2182_s15, 3 }
   0xa   : > { %s128_s22 = sshll.u32 %s2552_s0, 4  ;;  %s2184_s24 = smov [#allocation2]   ;;  %s129_s22 = int_to_ptr.hbm [resolvable:$true] %s128_s22 }
   0xb   : > { %p2253_p8 = pnand %p1912_p5, %p117_p7  ;;  %s130_s25 = sshll.u32 %s2184_s24, 4  ;;  %s131_s25 = int_to_ptr.vmem [resolvable:$true] %s130_s25 }
   0xc   : > { %s142_s28 = sshll.u32 %s2553_s1, 4  ;;  %s2185_s29 = smov 128   ;;  %s143_s28 = int_to_ptr.hbm [resolvable:$true] %s142_s28 }
   0xd   : > { %p1959_p9 = pneg %p2253_p8  ;;  %s2186_s30 = smov 8  }
   0xe   : > { %s2187_s4 = smov [#allocation5]   ;;  %s2272_s6 = sadd.s32 1, %s2182_s15  }
   0xf   : > { %p1960_p10 = pnand %p1959_p9, %p81_p1  ;;  %s144_s5 = sshll.u32 %s2187_s4, 4  ;;  %s145_s5 = int_to_ptr.vmem [resolvable:$true] %s144_s5 }
  0x10   : > { %s67_s7 = sadd.s32 1, %s2178_s14  ;;  %s64_s8 = ssub.s32 %s2182_s15, %s2272_s6 }
  0x11   : > { %1962 = dma.hbm_to_vmem [thread:$0]  (!%p1960_p10), %s129_s22, 256, %s131_s25, [#allocation3], %s2185_s29, %s2185_s29, %s2186_s30  }
  0x12   : > { %1965 = dma.hbm_to_vmem [thread:$0]  (!%p1960_p10), %s143_s28, 256, %s145_s5, [#allocation6], %s2185_s29, %s2185_s29, %s2186_s30  }
  0x13   : > { %p74_p12 = scmp.ne.s32.totalorder %s2178_s14, %s2174_s13  ;;  %p65_p13 = scmp.eq.s32.totalorder %s64_s8, 0 }
  0x14   : > { %p75_p0 = scmp.eq.s32.totalorder %s2182_s15, 0  ;;  %p1976_p7 = scmp.lt.s32.totalorder %s2182_s15, 2 }
  0x15   : > { %p2282_p3 = por %p104_p2, %p74_p12  ;;  %s158_s11 = sand.u32 1, %s2182_s15  }
  0x16   : > { %s2287_s10 = scalar_select %p65_p13, %s2178_s14, %s67_s7  }
  0x17   : > { %p76_p5 = por %p75_p0, %p74_p12  ;;  %s160_s17 = sand.u32 1, %s2178_s14  }
  0x18   : > { %s1916_s20 = sshll.u32 %s160_s17, 6  ;;  %s1944_s21 = sshll.u32 %s2182_s15, 6 }
  0x19   : > { %s168_s25 = scalar_lea.hbm %s2554_s2, %s1944_s21  ;;  %s162_s27 = scalar_lea.vmem [#allocation7], %s1916_s20 }
  0x1a   : > { %s169_s26 = sshll.u32 %s168_s25, 4  ;;  %s171_s28 = sshll.u32 %s162_s27, 4  ;;  %s170_s26 = int_to_ptr.hbm [resolvable:$true] %s169_s26  ;;  %s172_s28 = int_to_ptr.vmem [resolvable:$true] %s171_s28 }
  0x1b   : > { %p2296_p2 = pnand %p1976_p7, %p76_p5  ;;  %s159_s5 = scalar_lea.sflag [#allocation3], %s158_s11 }
  0x1c   : > { %s2078_s7 = sshra.s32 %s170_s26, 4  ;;  %s2085_s20 = scalar_lea.hbm %s2554_s2, 128  ;;  %s2079_s7 = int_to_ptr.hbm [resolvable:$true] %s2078_s7 }
  0x1d   : > { %s2080_s8 = scalar_lea.hbm %s2079_s7, 64  ;;  %p2082_p10 = pneg %p2296_p2 }
  0x1e   : > { %p2081_p9 = scmp.ne.s32.totalorder %s2079_s7, %s2080_s8  ;;  %p2086_p0 = scmp.lt.s32.totalorder %s2079_s7, %s2554_s2 }
  0x1f   : > { %p2087_p5 = scmp.lt.s32.totalorder %s2085_s20, %s2080_s8 }
  0x20   : > { %p2083_p12 = pnand %p2082_p10, %p2081_p9 }
  0x21   : > { %p2088_p7 = por %p2087_p5, %p2086_p0 }
  0x22   : > { %p2084_p13 = pneg %p2083_p12 }
  0x24   : > { %p2089_p11 = pnand %p2088_p7, %p2084_p13 }
  0x26   : > { %2092 = shalt.err (!%p2089_p11)
}
  0x27   : > { %1969 = dma.hbm_to_vmem [thread:$0]  (!%p2296_p2), %s170_s26, 1024, %s172_s28, %s159_s5, %s2185_s29, %s2185_s29, %s2186_s30  }
  0x28   : > { %183 = sbr.rel (%p2253_p8) target bundleno = 935 (0x3a7), region = 32 }
  0x2d   : > { %2153 = dma.done.wait (%p81_p1), [#allocation3], 256  }
  0x2e   : > { %2155 = vsyncadd (%p81_p1), [#allocation3], 4294967040 }
  0x2f   : > { %2157 = dma.done.wait (%p81_p1), [#allocation6], 256  }
  0x30   : > { %2159 = vsyncadd (%p81_p1), [#allocation6], 4294967040  ;;  %s195_s29 = sand.u32 1, %s2231_s16   ;;  %s197_s30 = sand.u32 1, %s2174_s13  }
  0x31   : > { %s2327_s23 = sshll.u32 %s197_s30, 6  ;;  %s196_s11 = scalar_lea.sflag [#allocation3], %s195_s29 }
  0x32   : > { %s2330_s25 = scalar_lea.vmem [#allocation7], %s2327_s23 }
  0x33   : > { %2161 = dma.done.wait (%p2240_p4), %s196_s11, 1024  }
  0x34   : > { %2163 = vsyncadd (%p2240_p4), %s196_s11, 4294966272  ;;  %vm231_vm0 = vcmask 130048   ;;  %v230_v0 = vld [vmem:[%s2330_s25 + $0x8] sm:$0xff]  ;;  %v229_v1 = vld [vmem:[%s2330_s25] sm:$0xff]  ;;  %s2441_s18 = scalar_lea.vmem [#allocation8], %s2327_s23  ;;  %s1946_s26 = sshll.u32 %s2231_s16, 6 }
  0x35   : > { %v225_v2 = vld [vmem:[#allocation2] sm:$0xff]  ;;  %v252_v3 = vand.u32 4294901760, %v230_v0  ;;  %v254_v4 = vand.u32 4294901760, %v229_v1  ;;  %v226_v6 = vld [vmem:[#allocation2 + $0x8] sm:$0xff]  ;;  %v228_v26 = vld [vmem:[#allocation5 + $0x8] sm:$0xff]  ;;  %s1815_s4 = scalar_lea.hbm %s2555_s3, %s1946_s26  ;;  %s1816_s5 = sshll.u32 %s2441_s18, 4  ;;  %s1817_s5 = int_to_ptr.vmem [resolvable:$true] %s1816_s5 }
  0x36   : > { %v233_v5 = vsel %vm231_vm0, %v225_v2, 0  ;;  %v236_v8 = vsel %vm231_vm0, %v226_v6, 0  ;;  %v2376_v27 = vand.u32 4294901760, %v228_v26  ;;  %v227_v28 = vld [vmem:[#allocation5] sm:$0xff]  ;;  %v1926_v43 = vld [vmem:[%s2330_s25 + $0x18] sm:$0xff]  ;;  %s1818_s7 = sshll.u32 %s1815_s4, 4  ;;  %s1819_s7 = int_to_ptr.hbm [resolvable:$true] %s1818_s7 }
  0x37   : > { %v2339_v7 = vand.u32 4294901760, %v233_v5  ;;  %v288_v9 = vsub.f32 %v230_v0, %v252_v3  ;;  %253 = vmatpush.msra.mxu0 %v252_v3  ;;  %v294_v10 = vsub.f32 %v229_v1, %v254_v4  ;;  %354 = vmatpush.msra.mxu3 %v252_v3  ;;  %v2342_v11 = vand.u32 4294901760, %v236_v8  ;;  %v1925_v50 = vld [vmem:[%s2330_s25 + $0x10] sm:$0xff]  ;;  %s1803_s16 = scalar_lea.sflag [#allocation4], %s197_s30  ;;  %s2122_s8 = sshra.s32 %s1819_s7, 4  ;;  %s2123_s8 = int_to_ptr.hbm [resolvable:$true] %s2122_s8 }
  0x38   : > { %v2380_v29 = vsub.f32 %v228_v26, %v2376_v27  ;;  %v2382_v30 = vand.u32 4294901760, %v227_v28  ;;  %v643_v44 = vand.u32 4294901760, %v1926_v43  ;;  %v645_v54 = vand.u32 4294901760, %v1925_v50  ;;  %s2124_s17 = scalar_lea.hbm %s2123_s8, 64  ;;  %s2128_s22 = scalar_lea.hbm %s2555_s3, 128 }
  0x39   : > { %v2345_v12 = vsub.f32 %v233_v5, %v2339_v7  ;;  %324 = vmatpush.msra.mxu2 %v288_v9  ;;  %255 = vmatpush.msra.mxu0 %v254_v4  ;;  %v289_v13 = vand.u32 4294901760, %v288_v9  ;;  %v295_v14 = vand.u32 4294901760, %v294_v10  ;;  %v2348_v15 = vsub.f32 %v236_v8, %v2342_v11  ;;  %p2125_p1 = scmp.ne.s32.totalorder %s2123_s8, %s2124_s17  ;;  %p2129_p11 = scmp.lt.s32.totalorder %s2123_s8, %s2555_s3 }
  0x3a   : > { %356 = vmatpush.msra.mxu3 %v254_v4  ;;  %v2386_v31 = vand.u32 4294901760, %v2380_v29  ;;  %v2389_v32 = vsub.f32 %v227_v28, %v2382_v30  ;;  %v679_v48 = vsub.f32 %v1926_v43, %v643_v44  ;;  %v685_v59 = vsub.f32 %v1925_v50, %v645_v54  ;;  %p2130_p2 = scmp.lt.s32.totalorder %s2128_s22, %s2124_s17 }
  0x3b   : > { %v2351_v16 = vand.u32 4294901760, %v2345_v12  ;;  %327 = vmatpush.msra.mxu2 %v294_v10  ;;  %v290_v17 = vsub.f32 %v288_v9, %v289_v13  ;;  %387 = vmatpush.msrb.mxu0 %v289_v13  ;;  %v296_v18 = vsub.f32 %v294_v10, %v295_v14  ;;  %v2358_v20 = vand.u32 4294901760, %v2348_v15  ;;  %p2126_p4 = pnand %p2125_p1, %p2282_p3 }
  0x3c   : > { %330 = vmatmul.f32.vlgmr.msra.gmra.mxu2 %v2345_v12  ;;  %v486_v33 = vsub.f32 %v2380_v29, %v2386_v31  ;;  %v2397_v34 = vand.u32 4294901760, %v2389_v32  ;;  %v680_v49 = vand.u32 4294901760, %v679_v48  ;;  %v686_v63 = vand.u32 4294901760, %v685_v59  ;;  %p2131_p9 = por %p2130_p2, %p2129_p11 }
  0x3d   : > { %v259_v19 = vsub.f32 %v2345_v12, %v2351_v16  ;;  %360 = vmatmul.f32.vlgmr.msra.gmra.mxu3 %v2351_v16  ;;  %v291_v21 = vand.u32 4294901760, %v290_v17  ;;  %v297_v22 = vand.u32 4294901760, %v296_v18  ;;  %391 = vmatpush.msrb.mxu0 %v295_v14  ;;  %v267_v24 = vsub.f32 %v2348_v15, %v2358_v20  ;;  %p2127_p8 = pneg %p2126_p4 }
  0x3e   : > { %449 = vmatpush.msrb.mxu2 %v2376_v27  ;;  %v2401_v35 = vand.u32 4294901760, %v486_v33  ;;  %v492_v36 = vsub.f32 %v2389_v32, %v2397_v34  ;;  %v681_v53 = vsub.f32 %v679_v48, %v680_v49  ;;  %v687_v2 = vsub.f32 %v685_v59, %v686_v63 }
  0x3f   : > { %v2360_v23 = vand.u32 4294901760, %v259_v19  ;;  %292 = vmatpush.msra.mxu1 %v291_v21  ;;  %v2367_v25 = vand.u32 4294901760, %v267_v24  ;;  %p2132_p10 = pnand %p2131_p9, %p2127_p8 }
  0x40   : > { %451 = vmatpush.msrb.mxu2 %v2382_v30  ;;  %488 = vmatpush.msrb.mxu3 %v2401_v35  ;;  %v2407_v37 = vand.u32 4294901760, %v492_v36  ;;  %v682_v58 = vand.u32 4294901760, %v681_v53  ;;  %v688_v5 = vand.u32 4294901760, %v687_v2 }
  0x41   : > { %261 = vmatmul.f32.vlgmr.msra.gmra.mxu0 %v2360_v23  ;;  %298 = vmatpush.msra.mxu1 %v297_v22 }
  0x42   : > { %300 = vmatmul.f32.vlgmr.msra.gmra.mxu1 %v2339_v7  ;;  %520 = vmatpush.msra.mxu0 %v2380_v29 }
  0x43   : > { %416 = vmatpush.msrb.mxu1 %v252_v3  ;;  %583 = vmatpush.msra.mxu2 %v2386_v31 }
  0x44   : > { %335 = vmatmul.f32.gmra.mxu2 %v2348_v15  ;;  %523 = vmatpush.msra.mxu0 %v2389_v32 }
  0x45   : > { %366 = vmatmul.f32.gmra.mxu3 %v2358_v20  ;;  %418 = vmatpush.msrb.mxu1 %v254_v4 }
  0x46   : > { %587 = vmatpush.msra.mxu2 %v2397_v34  ;;  %494 = vmatpush.msrb.mxu3 %v2407_v37 }
  0x47   : > { %550 = vmatpush.msra.mxu1 %v2376_v27 }
  0x48   : > { %612 = vmatpush.msra.mxu3 %v2376_v27 }
  0x49   : > { %269 = vmatmul.f32.gmra.mxu0 %v2367_v25  ;;  %552 = vmatpush.msra.mxu1 %v2382_v30 }
  0x4a   : > { %304 = vmatmul.f32.gmra.mxu1 %v2342_v11  ;;  %614 = vmatpush.msra.mxu3 %v2382_v30 }
  0x51   : > { %393 = vmatmul.f32.vlgmr.msrb.gmra.mxu0 %v2339_v7 }
  0x52   : > { %420 = vmatmul.f32.vlgmr.msrb.gmra.mxu1 %v2339_v7  ;;  %644 = vmatpush.msrb.mxu0 %v643_v44 }
  0x53   : > { %683 = vmatpush.msrb.mxu1 %v682_v58 }
  0x54   : > { %646 = vmatpush.msrb.mxu0 %v645_v54 }
  0x55   : > { %689 = vmatpush.msrb.mxu1 %v688_v5 }
  0x59   : > { %397 = vmatmul.f32.gmra.mxu0 %v2342_v11 }
  0x5a   : > { %424 = vmatmul.f32.gmra.mxu1 %v2342_v11 }
  0xbe   : > { %v262_v38 = vpop.f32.mrf.mxu0 }
  0xbf   : > { %v301_v39 = vpop.f32.mrf.mxu1  ;;  %v331_v40 = vpop.f32.mrf.mxu2 }
  0xc0   : > { %v302_v41 = vadd.f32 %v301_v39, %v262_v38  ;;  %v361_v45 = vpop.f32.mrf.mxu3 }
  0xc2   : > { %v332_v47 = vadd.f32 %v331_v40, %v302_v41 }
  0xc4   : > { %v362_v51 = vadd.f32 %v361_v45, %v332_v47 }
  0xc6   : > { %v270_v42 = vpop.f32.mrf.mxu0 }
  0xc7   : > { %v305_v46 = vpop.f32.mrf.mxu1  ;;  %v336_v55 = vpop.f32.mrf.mxu2 }
  0xc8   : > { %v306_v52 = vadd.f32 %v305_v46, %v270_v42  ;;  %v367_v0 = vpop.f32.mrf.mxu3 }
  0xca   : > { %v337_v61 = vadd.f32 %v336_v55, %v306_v52 }
  0xcc   : > { %v368_v4 = vadd.f32 %v367_v0, %v337_v61 }
  0xce   : > { %v394_v56 = vpop.f32.mrf.mxu0 }
  0xcf   : > { %v395_v57 = vadd.f32 %v394_v56, %v362_v51  ;;  %v421_v60 = vpop.f32.mrf.mxu1 }
  0xd1   : > { %v422_v62 = vadd.f32 %v421_v60, %v395_v57 }
  0xd3   : > { %v429_v1 = vsel %vm231_vm0, %v422_v62, 0  ;;  %v1930_v62 = vld [vmem:[%s2330_s25 + $0x28] sm:$0xff] }
  0xd4   : > { %v452_v3 = vand.u32 4294901760, %v429_v1 }
  0xd6   : > { %v453_v6 = vsub.f32 %v429_v1, %v452_v3  ;;  %v398_v8 = vpop.f32.mrf.mxu0  ;;  %496 = vmatmul.f32.vlgmr.msrb.gmra.mxu3 %v452_v3 }
  0xd7   : > { %v399_v9 = vadd.f32 %v398_v8, %v368_v4  ;;  %745 = vmatpush.msrb.mxu3 %v643_v44  ;;  %v425_v10 = vpop.f32.mrf.mxu1 }
  0xd8   : > { %526 = vmatmul.f32.vlgmr.msra.gmra.mxu0 %v453_v6  ;;  %v454_v13 = vand.u32 4294901760, %v453_v6 }
  0xd9   : > { %v426_v14 = vadd.f32 %v425_v10, %v399_v9  ;;  %747 = vmatpush.msrb.mxu3 %v645_v54  ;;  %778 = vmatpush.msra.mxu0 %v680_v49  ;;  %v1929_v9 = vld [vmem:[%s2330_s25 + $0x20] sm:$0xff] }
  0xda   : > { %556 = vmatmul.f32.vlgmr.msra.gmra.mxu1 %v454_v13  ;;  %v455_v17 = vsub.f32 %v453_v6, %v454_v13 }
  0xdb   : > { %v432_v18 = vsel %vm231_vm0, %v426_v14, 0  ;;  %807 = vmatpush.msra.mxu1 %v643_v44  ;;  %782 = vmatpush.msra.mxu0 %v686_v63  ;;  %v1035_v63 = vand.u32 4294901760, %v1930_v62  ;;  %v1037_v14 = vand.u32 4294901760, %v1929_v9 }
  0xdc   : > { %v460_v19 = vand.u32 4294901760, %v432_v18  ;;  %v456_v21 = vand.u32 4294901760, %v455_v17 }
  0xdd   : > { %809 = vmatpush.msra.mxu1 %v645_v54  ;;  %v1071_v2 = vsub.f32 %v1930_v62, %v1035_v63 }
  0xde   : > { %v461_v22 = vsub.f32 %v432_v18, %v460_v19  ;;  %457 = vmatmul.f32.vlgmr.msrb.gmra.mxu2 %v456_v21  ;;  %500 = vmatmul.f32.gmra.mxu3 %v460_v19 }
  0xdf   : > { %715 = vmatpush.msrb.mxu2 %v679_v48  ;;  %v1072_v6 = vand.u32 4294901760, %v1071_v2 }
  0xe0   : > { %531 = vmatmul.f32.gmra.mxu0 %v461_v22  ;;  %v462_v24 = vand.u32 4294901760, %v461_v22 }
  0xe1   : > { %718 = vmatpush.msrb.mxu2 %v685_v59  ;;  %v1073_v13 = vsub.f32 %v1071_v2, %v1072_v6 }
  0xe2   : > { %562 = vmatmul.f32.gmra.mxu1 %v462_v24  ;;  %v463_v26 = vsub.f32 %v461_v22, %v462_v24 }
  0xe3   : > { %v1074_v18 = vand.u32 4294901760, %v1073_v13 }
  0xe4   : > { %v464_v28 = vand.u32 4294901760, %v463_v26 }
  0xe6   : > { %465 = vmatmul.f32.gmra.mxu2 %v464_v28  ;;  %616 = vmatmul.f32.vlgmr.msra.gmra.mxu3 %v452_v3 }
  0xe7   : > { %879 = vmatpush.msra.mxu3 %v2401_v35 }
  0xe8   : > { %652 = vmatmul.f32.vlgmr.msrb.gmra.mxu0 %v2360_v23 }
  0xe9   : > { %885 = vmatpush.msra.mxu3 %v2407_v37  ;;  %911 = vmatpush.msrb.mxu0 %v2380_v29 }
  0xea   : > { %691 = vmatmul.f32.vlgmr.msrb.gmra.mxu1 %v2339_v7 }
  0xeb   : > { %914 = vmatpush.msrb.mxu0 %v2389_v32  ;;  %941 = vmatpush.msrb.mxu1 %v2376_v27 }
  0xed   : > { %943 = vmatpush.msrb.mxu1 %v2382_v30 }
  0xee   : > { %589 = vmatmul.f32.vlgmr.msra.gmra.mxu2 %v452_v3  ;;  %620 = vmatmul.f32.gmra.mxu3 %v460_v19 }
  0xef   : > { %840 = vmatpush.msra.mxu2 %v2376_v27 }
  0xf0   : > { %660 = vmatmul.f32.gmra.mxu0 %v2367_v25 }
  0xf1   : > { %842 = vmatpush.msra.mxu2 %v2382_v30 }
  0xf2   : > { %695 = vmatmul.f32.gmra.mxu1 %v2342_v11 }
  0xf6   : > { %593 = vmatmul.f32.gmra.mxu2 %v460_v19  ;;  %751 = vmatmul.f32.vlgmr.msrb.gmra.mxu3 %v2351_v16  ;;  %v1077_v19 = vsub.f32 %v1929_v9, %v1037_v14 }
  0xf7   : > { %1003 = vmatpush.msrb.mxu3 %v2376_v27 }
  0xf8   : > { %784 = vmatmul.f32.vlgmr.msra.gmra.mxu0 %v2339_v7  ;;  %v1078_v24 = vand.u32 4294901760, %v1077_v19 }
  0xf9   : > { %1005 = vmatpush.msrb.mxu3 %v2382_v30  ;;  %1036 = vmatpush.msra.mxu0 %v1035_v63 }
  0xfa   : > { %811 = vmatmul.f32.vlgmr.msra.gmra.mxu1 %v2339_v7 }
  0xfb   : > { %1038 = vmatpush.msra.mxu0 %v1037_v14  ;;  %1075 = vmatpush.msra.mxu1 %v1074_v18 }
  0xfe   : > { %721 = vmatmul.f32.vlgmr.msrb.gmra.mxu2 %v2345_v12  ;;  %757 = vmatmul.f32.gmra.mxu3 %v2358_v20 }
  0xff   : > { %974 = vmatpush.msrb.mxu2 %v2386_v31 }
 0x100   : > { %788 = vmatmul.f32.gmra.mxu0 %v2342_v11 }
 0x101   : > { %978 = vmatpush.msrb.mxu2 %v2397_v34 }
 0x102   : > { %815 = vmatmul.f32.gmra.mxu1 %v2342_v11 }
 0x106   : > { %726 = vmatmul.f32.gmra.mxu2 %v2348_v15 }
 0x155   : > { %v527_v36 = vpop.f32.mrf.mxu0 }
 0x157   : > { %v557_v38 = vpop.f32.mrf.mxu1 }
 0x159   : > { %v497_v33 = vpop.f32.mrf.mxu3 }
 0x15d   : > { %v532_v41 = vpop.f32.mrf.mxu0 }
 0x15f   : > { %v563_v43 = vpop.f32.mrf.mxu1 }
 0x161   : > { %v458_v39 = vpop.f32.mrf.mxu2  ;;  %v501_v40 = vpop.f32.mrf.mxu3 }
 0x162   : > { %v498_v42 = vadd.f32 %v497_v33, %v458_v39 }
 0x164   : > { %v528_v45 = vadd.f32 %v527_v36, %v498_v42 }
 0x165   : > { %v653_v47 = vpop.f32.mrf.mxu0 }
 0x166   : > { %v558_v49 = vadd.f32 %v557_v38, %v528_v45  ;;  %v1079_v38 = vsub.f32 %v1077_v19, %v1078_v24 }
 0x167   : > { %v692_v51 = vpop.f32.mrf.mxu1 }
 0x168   : > { %v693_v1 = vadd.f32 %v692_v51, %v653_v47  ;;  %v1080_v42 = vand.u32 4294901760, %v1079_v38 }
 0x169   : > { %v466_v44 = vpop.f32.mrf.mxu2  ;;  %v617_v46 = vpop.f32.mrf.mxu3 }
 0x16a   : > { %v502_v48 = vadd.f32 %v501_v40, %v466_v44  ;;  %1081 = vmatpush.msra.mxu1 %v1080_v42 }
 0x16c   : > { %v533_v53 = vadd.f32 %v532_v41, %v502_v48 }
 0x16d   : > { %v661_v56 = vpop.f32.mrf.mxu0 }
 0x16e   : > { %v564_v57 = vadd.f32 %v563_v43, %v533_v53 }
 0x16f   : > { %v696_v60 = vpop.f32.mrf.mxu1 }
 0x170   : > { %v697_v21 = vadd.f32 %v696_v60, %v661_v56 }
 0x171   : > { %v590_v50 = vpop.f32.mrf.mxu2  ;;  %v621_v55 = vpop.f32.mrf.mxu3 }
 0x172   : > { %v591_v52 = vadd.f32 %v590_v50, %v558_v49 }
 0x174   : > { %v618_v54 = vadd.f32 %v617_v46, %v591_v52 }
 0x175   : > { %v785_v4 = vpop.f32.mrf.mxu0 }
 0x176   : > { %624 = vst.msk [vmem:[%s2441_s18] sm:$0xff] %vm231_vm0, %v618_v54 }
 0x177   : > { %v812_v8 = vpop.f32.mrf.mxu1 }
 0x179   : > { %v594_v58 = vpop.f32.mrf.mxu2  ;;  %v752_v0 = vpop.f32.mrf.mxu3 }
 0x17a   : > { %v595_v59 = vadd.f32 %v594_v58, %v564_v57 }
 0x17c   : > { %v622_v61 = vadd.f32 %v621_v55, %v595_v59 }
 0x17d   : > { %v789_v40 = vpop.f32.mrf.mxu0 }
 0x17e   : > { %625 = vst.msk [vmem:[%s2441_s18 + $0x8] sm:$0xff] %vm231_vm0, %v622_v61 }
 0x17f   : > { %v816_v44 = vpop.f32.mrf.mxu1 }
 0x181   : > { %v722_v3 = vpop.f32.mrf.mxu2  ;;  %v758_v28 = vpop.f32.mrf.mxu3 }
 0x182   : > { %v723_v5 = vadd.f32 %v722_v3, %v693_v1 }
 0x184   : > { %v753_v10 = vadd.f32 %v752_v0, %v723_v5 }
 0x186   : > { %v786_v17 = vadd.f32 %v785_v4, %v753_v10 }
 0x188   : > { %v813_v22 = vadd.f32 %v812_v8, %v786_v17 }
 0x189   : > { %v727_v26 = vpop.f32.mrf.mxu2 }
 0x18a   : > { %v820_v33 = vsel %vm231_vm0, %v813_v22, 0  ;;  %v728_v36 = vadd.f32 %v727_v26, %v697_v21  ;;  %v1934_v26 = vld [vmem:[%s2330_s25 + $0x38] sm:$0xff] }
 0x18b   : > { %v843_v39 = vand.u32 4294901760, %v820_v33 }
 0x18c   : > { %v759_v41 = vadd.f32 %v758_v28, %v728_v36  ;;  %v1427_v28 = vand.u32 4294901760, %v1934_v26 }
 0x18d   : > { %v844_v43 = vsub.f32 %v820_v33, %v843_v39  ;;  %887 = vmatmul.f32.vlgmr.msra.gmra.mxu3 %v843_v39 }
 0x18e   : > { %v790_v45 = vadd.f32 %v789_v40, %v759_v41  ;;  %1137 = vmatpush.msra.mxu3 %v1035_v63  ;;  %v1463_v38 = vsub.f32 %v1934_v26, %v1427_v28 }
 0x18f   : > { %917 = vmatmul.f32.vlgmr.msrb.gmra.mxu0 %v844_v43  ;;  %v845_v46 = vand.u32 4294901760, %v844_v43 }
 0x190   : > { %v817_v47 = vadd.f32 %v816_v44, %v790_v45  ;;  %1139 = vmatpush.msra.mxu3 %v1037_v14  ;;  %1170 = vmatpush.msrb.mxu0 %v1072_v6  ;;  %v1464_v42 = vand.u32 4294901760, %v1463_v38  ;;  %v1933_v44 = vld [vmem:[%s2330_s25 + $0x30] sm:$0xff] }
 0x191   : > { %947 = vmatmul.f32.vlgmr.msrb.gmra.mxu1 %v845_v46  ;;  %v846_v48 = vsub.f32 %v844_v43, %v845_v46 }
 0x192   : > { %v823_v49 = vsel %vm231_vm0, %v817_v47, 0  ;;  %1199 = vmatpush.msrb.mxu1 %v1035_v63  ;;  %1174 = vmatpush.msrb.mxu0 %v1078_v24  ;;  %v1465_v46 = vsub.f32 %v1463_v38, %v1464_v42  ;;  %v1429_v47 = vand.u32 4294901760, %v1933_v44 }
 0x193   : > { %v851_v50 = vand.u32 4294901760, %v823_v49  ;;  %v847_v51 = vand.u32 4294901760, %v846_v48 }
 0x194   : > { %1201 = vmatpush.msrb.mxu1 %v1037_v14 }
 0x195   : > { %v852_v52 = vsub.f32 %v823_v49, %v851_v50  ;;  %848 = vmatmul.f32.vlgmr.msra.gmra.mxu2 %v847_v51  ;;  %891 = vmatmul.f32.gmra.mxu3 %v851_v50  ;;  %v1466_v49 = vand.u32 4294901760, %v1465_v46 }
 0x196   : > { %1107 = vmatpush.msra.mxu2 %v1071_v2 }
 0x197   : > { %922 = vmatmul.f32.gmra.mxu0 %v852_v52  ;;  %v853_v53 = vand.u32 4294901760, %v852_v52 }
 0x198   : > { %1110 = vmatpush.msra.mxu2 %v1077_v19 }
 0x199   : > { %953 = vmatmul.f32.gmra.mxu1 %v853_v53  ;;  %v854_v54 = vsub.f32 %v852_v52, %v853_v53 }
 0x19b   : > { %v855_v55 = vand.u32 4294901760, %v854_v54 }
 0x19d   : > { %856 = vmatmul.f32.gmra.mxu2 %v855_v55  ;;  %1007 = vmatmul.f32.vlgmr.msrb.gmra.mxu3 %v843_v39 }
 0x19e   : > { %1271 = vmatpush.msrb.mxu3 %v2401_v35 }
 0x19f   : > { %1044 = vmatmul.f32.vlgmr.msra.gmra.mxu0 %v2360_v23 }
 0x1a0   : > { %1277 = vmatpush.msrb.mxu3 %v2407_v37  ;;  %1303 = vmatpush.msra.mxu0 %v2380_v29 }
 0x1a1   : > { %1083 = vmatmul.f32.vlgmr.msra.gmra.mxu1 %v2339_v7 }
 0x1a2   : > { %1306 = vmatpush.msra.mxu0 %v2389_v32  ;;  %1333 = vmatpush.msra.mxu1 %v2376_v27 }
 0x1a4   : > { %1335 = vmatpush.msra.mxu1 %v2382_v30 }
 0x1a5   : > { %980 = vmatmul.f32.vlgmr.msrb.gmra.mxu2 %v843_v39  ;;  %1011 = vmatmul.f32.gmra.mxu3 %v851_v50 }
 0x1a6   : > { %1232 = vmatpush.msrb.mxu2 %v2376_v27 }
 0x1a7   : > { %1052 = vmatmul.f32.gmra.mxu0 %v2367_v25 }
 0x1a8   : > { %1234 = vmatpush.msrb.mxu2 %v2382_v30 }
 0x1a9   : > { %1087 = vmatmul.f32.gmra.mxu1 %v2342_v11 }
 0x1ad   : > { %984 = vmatmul.f32.gmra.mxu2 %v851_v50  ;;  %1143 = vmatmul.f32.vlgmr.msra.gmra.mxu3 %v2351_v16  ;;  %v1469_v50 = vsub.f32 %v1933_v44, %v1429_v47 }
 0x1ae   : > { %1395 = vmatpush.msra.mxu3 %v2376_v27 }
 0x1af   : > { %1176 = vmatmul.f32.vlgmr.msrb.gmra.mxu0 %v2339_v7  ;;  %v1470_v53 = vand.u32 4294901760, %v1469_v50 }
 0x1b0   : > { %1397 = vmatpush.msra.mxu3 %v2382_v30  ;;  %1428 = vmatpush.msrb.mxu0 %v1427_v28 }
 0x1b1   : > { %1203 = vmatmul.f32.vlgmr.msrb.gmra.mxu1 %v2339_v7 }
 0x1b2   : > { %1430 = vmatpush.msrb.mxu0 %v1429_v47  ;;  %1467 = vmatpush.msrb.mxu1 %v1466_v49 }
 0x1b5   : > { %1113 = vmatmul.f32.vlgmr.msra.gmra.mxu2 %v2345_v12  ;;  %1149 = vmatmul.f32.gmra.mxu3 %v2358_v20 }
 0x1b6   : > { %1366 = vmatpush.msra.mxu2 %v2386_v31 }
 0x1b7   : > { %1180 = vmatmul.f32.gmra.mxu0 %v2342_v11 }
 0x1b8   : > { %1370 = vmatpush.msra.mxu2 %v2397_v34 }
 0x1b9   : > { %1207 = vmatmul.f32.gmra.mxu1 %v2342_v11 }
 0x1bd   : > { %1118 = vmatmul.f32.gmra.mxu2 %v2348_v15 }
 0x20c   : > { %v918_v57 = vpop.f32.mrf.mxu0 }
 0x20e   : > { %v948_v58 = vpop.f32.mrf.mxu1 }
 0x210   : > { %v888_v56 = vpop.f32.mrf.mxu3 }
 0x214   : > { %v923_v61 = vpop.f32.mrf.mxu0 }
 0x216   : > { %v954_v63 = vpop.f32.mrf.mxu1 }
 0x218   : > { %v849_v59 = vpop.f32.mrf.mxu2  ;;  %v892_v60 = vpop.f32.mrf.mxu3 }
 0x219   : > { %v889_v62 = vadd.f32 %v888_v56, %v849_v59 }
 0x21b   : > { %v919_v1 = vadd.f32 %v918_v57, %v889_v62 }
 0x21c   : > { %v1045_v3 = vpop.f32.mrf.mxu0 }
 0x21d   : > { %v949_v5 = vadd.f32 %v948_v58, %v919_v1  ;;  %v1471_v58 = vsub.f32 %v1469_v50, %v1470_v53 }
 0x21e   : > { %v1084_v8 = vpop.f32.mrf.mxu1 }
 0x21f   : > { %v1085_v36 = vadd.f32 %v1084_v8, %v1045_v3  ;;  %v1472_v62 = vand.u32 4294901760, %v1471_v58 }
 0x220   : > { %v857_v0 = vpop.f32.mrf.mxu2  ;;  %v1008_v2 = vpop.f32.mrf.mxu3 }
 0x221   : > { %v893_v4 = vadd.f32 %v892_v60, %v857_v0  ;;  %1473 = vmatpush.msrb.mxu1 %v1472_v62 }
 0x223   : > { %v924_v10 = vadd.f32 %v923_v61, %v893_v4 }
 0x224   : > { %v1053_v17 = vpop.f32.mrf.mxu0 }
 0x225   : > { %v955_v18 = vadd.f32 %v954_v63, %v924_v10 }
 0x226   : > { %v1088_v22 = vpop.f32.mrf.mxu1 }
 0x227   : > { %v1089_v51 = vadd.f32 %v1088_v22, %v1053_v17 }
 0x228   : > { %v981_v6 = vpop.f32.mrf.mxu2  ;;  %v1012_v14 = vpop.f32.mrf.mxu3 }
 0x229   : > { %v982_v9 = vadd.f32 %v981_v6, %v949_v5 }
 0x22b   : > { %v1009_v13 = vadd.f32 %v1008_v2, %v982_v9 }
 0x22c   : > { %v1177_v40 = vpop.f32.mrf.mxu0 }
 0x22d   : > { %1927 = vst.msk [vmem:[%s2441_s18 + $0x10] sm:$0xff] %vm231_vm0, %v1009_v13 }
 0x22e   : > { %v1204_v43 = vpop.f32.mrf.mxu1 }
 0x230   : > { %v985_v19 = vpop.f32.mrf.mxu2  ;;  %v1144_v33 = vpop.f32.mrf.mxu3 }
 0x231   : > { %v986_v21 = vadd.f32 %v985_v19, %v955_v18 }
 0x233   : > { %v1013_v24 = vadd.f32 %v1012_v14, %v986_v21 }
 0x234   : > { %v1181_v60 = vpop.f32.mrf.mxu0 }
 0x235   : > { %1928 = vst.msk [vmem:[%s2441_s18 + $0x18] sm:$0xff] %vm231_vm0, %v1013_v24 }
 0x236   : > { %v1208_v0 = vpop.f32.mrf.mxu1 }
 0x238   : > { %v1114_v39 = vpop.f32.mrf.mxu2  ;;  %v1150_v55 = vpop.f32.mrf.mxu3 }
 0x239   : > { %v1115_v41 = vadd.f32 %v1114_v39, %v1085_v36 }
 0x23b   : > { %v1145_v45 = vadd.f32 %v1144_v33, %v1115_v41 }
 0x23d   : > { %v1178_v48 = vadd.f32 %v1177_v40, %v1145_v45 }
 0x23f   : > { %v1205_v52 = vadd.f32 %v1204_v43, %v1178_v48 }
 0x240   : > { %v1119_v54 = vpop.f32.mrf.mxu2 }
 0x241   : > { %v1212_v56 = vsel %vm231_vm0, %v1205_v52, 0  ;;  %v1120_v57 = vadd.f32 %v1119_v54, %v1089_v51 }
 0x242   : > { %v1235_v59 = vand.u32 4294901760, %v1212_v56 }
 0x243   : > { %v1151_v61 = vadd.f32 %v1150_v55, %v1120_v57 }
 0x244   : > { %v1236_v63 = vsub.f32 %v1212_v56, %v1235_v59  ;;  %1279 = vmatmul.f32.vlgmr.msrb.gmra.mxu3 %v1235_v59 }
 0x245   : > { %v1182_v1 = vadd.f32 %v1181_v60, %v1151_v61  ;;  %1529 = vmatpush.msrb.mxu3 %v1427_v28 }
 0x246   : > { %1309 = vmatmul.f32.vlgmr.msra.gmra.mxu0 %v1236_v63  ;;  %v1237_v2 = vand.u32 4294901760, %v1236_v63 }
 0x247   : > { %v1209_v3 = vadd.f32 %v1208_v0, %v1182_v1  ;;  %1531 = vmatpush.msrb.mxu3 %v1429_v47  ;;  %1562 = vmatpush.msra.mxu0 %v1464_v42 }
 0x248   : > { %1339 = vmatmul.f32.vlgmr.msra.gmra.mxu1 %v1237_v2  ;;  %v1238_v4 = vsub.f32 %v1236_v63, %v1237_v2 }
 0x249   : > { %v1215_v5 = vsel %vm231_vm0, %v1209_v3, 0  ;;  %1591 = vmatpush.msra.mxu1 %v1427_v28  ;;  %1566 = vmatpush.msra.mxu0 %v1470_v53 }
 0x24a   : > { %v1243_v6 = vand.u32 4294901760, %v1215_v5  ;;  %v1239_v8 = vand.u32 4294901760, %v1238_v4 }
 0x24b   : > { %1593 = vmatpush.msra.mxu1 %v1429_v47 }
 0x24c   : > { %v1244_v9 = vsub.f32 %v1215_v5, %v1243_v6  ;;  %1240 = vmatmul.f32.vlgmr.msrb.gmra.mxu2 %v1239_v8  ;;  %1283 = vmatmul.f32.gmra.mxu3 %v1243_v6 }
 0x24d   : > { %1499 = vmatpush.msrb.mxu2 %v1463_v38 }
 0x24e   : > { %1314 = vmatmul.f32.gmra.mxu0 %v1244_v9  ;;  %v1245_v10 = vand.u32 4294901760, %v1244_v9 }
 0x24f   : > { %1502 = vmatpush.msrb.mxu2 %v1469_v50 }
 0x250   : > { %1345 = vmatmul.f32.gmra.mxu1 %v1245_v10  ;;  %v1246_v13 = vsub.f32 %v1244_v9, %v1245_v10 }
 0x252   : > { %v1247_v14 = vand.u32 4294901760, %v1246_v13 }
 0x254   : > { %1248 = vmatmul.f32.gmra.mxu2 %v1247_v14  ;;  %1399 = vmatmul.f32.vlgmr.msra.gmra.mxu3 %v1235_v59 }
 0x255   : > { %1663 = vmatpush.msra.mxu3 %v2401_v35 }
 0x256   : > { %1436 = vmatmul.f32.vlgmr.msrb.gmra.mxu0 %v2360_v23 }
 0x257   : > { %1669 = vmatpush.msra.mxu3 %v2407_v37  ;;  %1695 = vmatpush.msrb.mxu0 %v2380_v29 }
 0x258   : > { %1475 = vmatmul.f32.vlgmr.msrb.gmra.mxu1 %v2339_v7 }
 0x259   : > { %1698 = vmatpush.msrb.mxu0 %v2389_v32  ;;  %1725 = vmatpush.msrb.mxu1 %v2376_v27 }
 0x25b   : > { %1727 = vmatpush.msrb.mxu1 %v2382_v30 }
 0x25c   : > { %1372 = vmatmul.f32.vlgmr.msra.gmra.mxu2 %v1235_v59  ;;  %1403 = vmatmul.f32.gmra.mxu3 %v1243_v6 }
 0x25d   : > { %1624 = vmatpush.msra.mxu2 %v2376_v27 }
 0x25e   : > { %1444 = vmatmul.f32.gmra.mxu0 %v2367_v25 }
 0x25f   : > { %1626 = vmatpush.msra.mxu2 %v2382_v30 }
 0x260   : > { %1479 = vmatmul.f32.gmra.mxu1 %v2342_v11 }
 0x264   : > { %1376 = vmatmul.f32.gmra.mxu2 %v1243_v6  ;;  %1535 = vmatmul.f32.vlgmr.msrb.gmra.mxu3 %v2351_v16 }
 0x265   : > { %1787 = vmatpush.msrb.mxu3 %v2376_v27 }
 0x266   : > { %1568 = vmatmul.f32.vlgmr.msra.gmra.mxu0 %v2339_v7 }
 0x267   : > { %1789 = vmatpush.msrb.mxu3 %v2382_v30 }
 0x268   : > { %1595 = vmatmul.f32.vlgmr.msra.gmra.mxu1 %v2339_v7 }
 0x26c   : > { %1505 = vmatmul.f32.vlgmr.msrb.gmra.mxu2 %v2345_v12  ;;  %1541 = vmatmul.f32.gmra.mxu3 %v2358_v20 }
 0x26d   : > { %1758 = vmatpush.msrb.mxu2 %v2386_v31 }
 0x26e   : > { %1572 = vmatmul.f32.gmra.mxu0 %v2342_v11 }
 0x26f   : > { %1762 = vmatpush.msrb.mxu2 %v2397_v34 }
 0x270   : > { %1599 = vmatmul.f32.gmra.mxu1 %v2342_v11 }
 0x274   : > { %1510 = vmatmul.f32.gmra.mxu2 %v2348_v15 }
 0x2c3   : > { %v1310_v23 = vpop.f32.mrf.mxu0 }
 0x2c5   : > { %v1340_v25 = vpop.f32.mrf.mxu1 }
 0x2c7   : > { %v1280_v16 = vpop.f32.mrf.mxu3 }
 0x2cb   : > { %v1315_v29 = vpop.f32.mrf.mxu0 }
 0x2cd   : > { %v1346_v30 = vpop.f32.mrf.mxu1 }
 0x2cf   : > { %v1241_v27 = vpop.f32.mrf.mxu2  ;;  %v1284_v7 = vpop.f32.mrf.mxu3 }
 0x2d0   : > { %v1281_v12 = vadd.f32 %v1280_v16, %v1241_v27 }
 0x2d2   : > { %v1311_v32 = vadd.f32 %v1310_v23, %v1281_v12 }
 0x2d3   : > { %v1437_v35 = vpop.f32.mrf.mxu0 }
 0x2d4   : > { %v1341_v34 = vadd.f32 %v1340_v25, %v1311_v32 }
 0x2d5   : > { %v1476_v11 = vpop.f32.mrf.mxu1 }
 0x2d6   : > { %v1477_v39 = vadd.f32 %v1476_v11, %v1437_v35 }
 0x2d7   : > { %v1249_v20 = vpop.f32.mrf.mxu2  ;;  %v1400_v31 = vpop.f32.mrf.mxu3 }
 0x2d8   : > { %v1285_v37 = vadd.f32 %v1284_v7, %v1249_v20 }
 0x2da   : > { %v1316_v15 = vadd.f32 %v1315_v29, %v1285_v37 }
 0x2db   : > { %v1445_v22 = vpop.f32.mrf.mxu0 }
 0x2dc   : > { %v1347_v24 = vadd.f32 %v1346_v30, %v1316_v15 }
 0x2dd   : > { %v1480_v33 = vpop.f32.mrf.mxu1 }
 0x2de   : > { %v1481_v46 = vadd.f32 %v1480_v33, %v1445_v22 }
 0x2df   : > { %v1373_v17 = vpop.f32.mrf.mxu2  ;;  %v1404_v21 = vpop.f32.mrf.mxu3 }
 0x2e0   : > { %v1374_v18 = vadd.f32 %v1373_v17, %v1341_v34 }
 0x2e2   : > { %v1401_v19 = vadd.f32 %v1400_v31, %v1374_v18 }
 0x2e3   : > { %v1569_v41 = vpop.f32.mrf.mxu0 }
 0x2e4   : > { %1931 = vst.msk [vmem:[%s2441_s18 + $0x20] sm:$0xff] %vm231_vm0, %v1401_v19 }
 0x2e5   : > { %v1596_v43 = vpop.f32.mrf.mxu1 }
 0x2e7   : > { %v1377_v26 = vpop.f32.mrf.mxu2  ;;  %v1536_v38 = vpop.f32.mrf.mxu3 }
 0x2e8   : > { %v1378_v28 = vadd.f32 %v1377_v26, %v1347_v24 }
 0x2ea   : > { %v1405_v36 = vadd.f32 %v1404_v21, %v1378_v28 }
 0x2eb   : > { %v1573_v53 = vpop.f32.mrf.mxu0 }
 0x2ec   : > { %1932 = vst.msk [vmem:[%s2441_s18 + $0x28] sm:$0xff] %vm231_vm0, %v1405_v36 }
 0x2ed   : > { %v1600_v56 = vpop.f32.mrf.mxu1 }
 0x2ef   : > { %v1506_v40 = vpop.f32.mrf.mxu2  ;;  %v1542_v49 = vpop.f32.mrf.mxu3 }
 0x2f0   : > { %v1507_v42 = vadd.f32 %v1506_v40, %v1477_v39 }
 0x2f2   : > { %v1537_v44 = vadd.f32 %v1536_v38, %v1507_v42 }
 0x2f4   : > { %v1570_v45 = vadd.f32 %v1569_v41, %v1537_v44 }
 0x2f6   : > { %v1597_v47 = vadd.f32 %v1596_v43, %v1570_v45 }
 0x2f7   : > { %v1511_v48 = vpop.f32.mrf.mxu2 }
 0x2f8   : > { %v1604_v50 = vsel %vm231_vm0, %v1597_v47, 0  ;;  %v1512_v51 = vadd.f32 %v1511_v48, %v1481_v46 }
 0x2f9   : > { %v1627_v52 = vand.u32 4294901760, %v1604_v50 }
 0x2fa   : > { %v1543_v54 = vadd.f32 %v1542_v49, %v1512_v51 }
 0x2fb   : > { %v1628_v55 = vsub.f32 %v1604_v50, %v1627_v52  ;;  %1671 = vmatmul.f32.vlgmr.msra.gmra.mxu3 %v1627_v52 }
 0x2fc   : > { %v1574_v57 = vadd.f32 %v1573_v53, %v1543_v54 }
 0x2fd   : > { %1701 = vmatmul.f32.vlgmr.msrb.gmra.mxu0 %v1628_v55  ;;  %v1629_v58 = vand.u32 4294901760, %v1628_v55 }
 0x2fe   : > { %v1601_v59 = vadd.f32 %v1600_v56, %v1574_v57 }
 0x2ff   : > { %1731 = vmatmul.f32.vlgmr.msrb.gmra.mxu1 %v1629_v58  ;;  %v1630_v60 = vsub.f32 %v1628_v55, %v1629_v58 }
 0x300   : > { %v1607_v61 = vsel %vm231_vm0, %v1601_v59, 0 }
 0x301   : > { %v1635_v62 = vand.u32 4294901760, %v1607_v61  ;;  %v1631_v63 = vand.u32 4294901760, %v1630_v60 }
 0x303   : > { %v1636_v0 = vsub.f32 %v1607_v61, %v1635_v62  ;;  %1632 = vmatmul.f32.vlgmr.msra.gmra.mxu2 %v1631_v63  ;;  %1675 = vmatmul.f32.gmra.mxu3 %v1635_v62 }
 0x305   : > { %1706 = vmatmul.f32.gmra.mxu0 %v1636_v0  ;;  %v1637_v1 = vand.u32 4294901760, %v1636_v0 }
 0x307   : > { %1737 = vmatmul.f32.gmra.mxu1 %v1637_v1  ;;  %v1638_v2 = vsub.f32 %v1636_v0, %v1637_v1 }
 0x309   : > { %v1639_v3 = vand.u32 4294901760, %v1638_v2 }
 0x30b   : > { %1640 = vmatmul.f32.gmra.mxu2 %v1639_v3  ;;  %1791 = vmatmul.f32.vlgmr.msrb.gmra.mxu3 %v1627_v52 }
 0x313   : > { %1764 = vmatmul.f32.vlgmr.msrb.gmra.mxu2 %v1627_v52  ;;  %1795 = vmatmul.f32.gmra.mxu3 %v1635_v62 }
 0x31b   : > { %1768 = vmatmul.f32.gmra.mxu2 %v1635_v62 }
 0x37a   : > { %v1702_v9 = vpop.f32.mrf.mxu0 }
 0x37c   : > { %v1732_v14 = vpop.f32.mrf.mxu1 }
 0x37e   : > { %v1672_v4 = vpop.f32.mrf.mxu3 }
 0x382   : > { %v1707_v29 = vpop.f32.mrf.mxu0 }
 0x384   : > { %v1738_v20 = vpop.f32.mrf.mxu1 }
 0x386   : > { %v1633_v5 = vpop.f32.mrf.mxu2  ;;  %v1676_v6 = vpop.f32.mrf.mxu3 }
 0x387   : > { %v1673_v8 = vadd.f32 %v1672_v4, %v1633_v5 }
 0x389   : > { %v1703_v13 = vadd.f32 %v1702_v9, %v1673_v8 }
 0x38b   : > { %v1733_v23 = vadd.f32 %v1732_v14, %v1703_v13 }
 0x38e   : > { %v1641_v10 = vpop.f32.mrf.mxu2  ;;  %v1792_v25 = vpop.f32.mrf.mxu3 }
 0x38f   : > { %v1677_v16 = vadd.f32 %v1676_v6, %v1641_v10 }
 0x391   : > { %v1708_v12 = vadd.f32 %v1707_v29, %v1677_v16 }
 0x393   : > { %v1739_v32 = vadd.f32 %v1738_v20, %v1708_v12 }
 0x396   : > { %v1765_v27 = vpop.f32.mrf.mxu2  ;;  %v1796_v37 = vpop.f32.mrf.mxu3 }
 0x397   : > { %v1766_v7 = vadd.f32 %v1765_v27, %v1733_v23 }
 0x399   : > { %v1793_v30 = vadd.f32 %v1792_v25, %v1766_v7 }
 0x39b   : > { %1935 = vst.msk [vmem:[%s2441_s18 + $0x30] sm:$0xff] %vm231_vm0, %v1793_v30 }
 0x39e   : > { %v1769_v31 = vpop.f32.mrf.mxu2 }
 0x39f   : > { %v1770_v35 = vadd.f32 %v1769_v31, %v1739_v32 }
 0x3a1   : > { %v1797_v34 = vadd.f32 %v1796_v37, %v1770_v35 }
 0x3a3   : > { %1936 = vst.msk [vmem:[%s2441_s18 + $0x38] sm:$0xff] %vm231_vm0, %v1797_v34 }
 0x3a4   : > { %2135 = shalt.err (!%p2132_p10)
}
 0x3a5   : > { %s2188_s30 = smov 128   ;;  %s2189_s23 = smov 8  }
 0x3a6   : > { %1957 = dma.vmem_to_hbm [thread:$0]  (%p2282_p3), %s1817_s5, 1024, %s1819_s7, %s1803_s16, %s2188_s30, %s2188_s30, %s2189_s23  }
 0x3a7 PF: > { %s1833_s11 = sand.u32 1, %s2170_s12   ;;  %p2561_p12 = scmp.ge.s32.totalorder %s2182_s15, 2 }
 0x3a8   : > { %s1834_s25 = scalar_lea.sflag [#allocation4], %s1833_s11 }
 0x3a9   : > { %p1971_p13 = pnand %p2561_p12, %p2245_p6 }
 0x3ab   : > { %p1972_p0 = pneg %p1971_p13 }
 0x3ad   : > { %2165 = dma.done.wait (%p1972_p0), %s1834_s25, 1024  }
 0x3ae   : > { %2167 = vsyncadd (%p1972_p0), %s1834_s25, 4294966272  ;;  %p15_p5 = scmp.ge.s32.totalorder %s2272_s6, 4   ;;  %s2562_s12 = smov %s2174_s13 }
 0x3af   : > { %s2563_s13 = smov %s2178_s14  ;;  %s2564_s14 = smov %s2287_s10 }
 0x3b0   : > { %s2565_s15 = smov %s2272_s6  ;;  %17 = sbr.rel (!%p15_p5) target bundleno = 5 (0x5), region = 90 }
 0x3b5   :  { %1840 = vsyncpa [#allocation3], 1 }
 0x3b6   :  { %1842 = vsyncpa [#allocation3 + $0x1], 1 }
 0x3b7   :  { %1843 = vsyncpa [#allocation6], 1 }
 0x3b8   :  { %1844 = vsyncpa [#allocation4], 1 }
 0x3b9   :  { %1846 = vsyncpa [#allocation4 + $0x1], 1 }

</bundles_post_ra>
